<compile_context>
chip_gen: v5e
topology: v5e:2x2
jax: 0.10.0
libtpu: 0.0.40
codegen_flags: <defaults>
</compile_context>

<pallas_src>
import jax
import jax.numpy as jnp
from jax.experimental import pallas as pl
from jax.experimental.pallas import tpu as pltpu

IN_DIM = 32
LATENT = 64


def _leaky(v):
    # nn.LeakyReLU default negative_slope = 0.01
    return jnp.where(v > 0, v, 0.01 * v)


def _vmem_cap_bytes():
    try:
        return int(pltpu.get_tpu_info().vmem_capacity_bytes)
    except Exception:
        return 64 * 1024 * 1024        # conservative fallback (v7x per-TC)


def _pick_tile(n, target, *, align=8, ensure_split=False,
               per_row_bytes=0, fixed_bytes=0, budget=None):
    """Largest multiple of `align` dividing n that is <= target, <= n//2 when
    ensure_split (so the 'parallel' row axis has >= 2 steps and can be sharded
    across v7x's two TensorCores), and whose per-step VMEM footprint fits."""
    if n % align != 0:
        return n                       # TODO(synk): pad N for odd graph sizes instead
    limit = min(target, n)
    if ensure_split and n >= 2 * align:
        limit = min(limit, n // 2)
    t = max(align, (limit // align) * align)
    while t >= align:
        if n % t == 0 and (budget is None or fixed_bytes + t * per_row_bytes <= budget):
            return t
        t -= align
    return align


def _resident(shape):
    """Full-array block that stays resident across the row grid (DMA'd once).
    (On v7x one could add pipeline_mode=pl.Buffered(1) to single-buffer these.)"""
    nd = len(shape)
    return pl.BlockSpec(shape, lambda *_: (0,) * nd)


# --------------------------------------------------------------------------
# Kernel A: node encoders (row-tiled).  One lane-dense output block
#   enc = [ he | rinv * (hk @ kW) ]   (TM, 2*latent) = (TM, 128)
# --------------------------------------------------------------------------
def encode_kernel(x_ref, rinv_ref, WeT_ref, be_ref, WkT_ref, bk_ref, kW_ref, enc_ref):
    f32 = jnp.float32
    x = x_ref[...]                                                     # (TM, in_dim)
    he = _leaky(jnp.dot(x, WeT_ref[...], preferred_element_type=f32) + be_ref[...])
    hk = _leaky(jnp.dot(x, WkT_ref[...], preferred_element_type=f32) + bk_ref[...])
    # reassociated GCN chain with the column D^-1/2 folded in:
    #   (D^-1/2 A D^-1/2) hk kW == rinv_i * (A @ (rinv_j * (hk @ kW)))
    hkw = jnp.dot(hk, kW_ref[...], preferred_element_type=f32) * rinv_ref[...]
    enc_ref[...] = jnp.concatenate([he, hkw], axis=-1)                 # lane-dense store


# --------------------------------------------------------------------------
# Kernel B: row-tiled main kernel — edge probabilities ('u-v-dist') and the
# k estimate ('gcn-x-deg', k-head fused into a single matmul).
# --------------------------------------------------------------------------
def dgg_main_kernel(adj_ref, he_row_ref, heT_ref, hn2_row_ref, hn2_col_ref,
                    hkw_ref, rinv_row_ref, ndeg_row_ref,
                    WexT_ref, WedT_ref, bemb_ref, Wkf_ref, bkf_ref,
                    edge_p_ref, k_ref):
    f32 = jnp.float32
    adj = adj_ref[...]                                                 # (TM, N)

    # ---- edge_prob_net 'u-v-dist': Gram-identity distance on the MXU ----
    gram = jnp.dot(he_row_ref[...], heT_ref[...], preferred_element_type=f32)
    dist2 = jnp.maximum(hn2_row_ref[...] + hn2_col_ref[...] - 2.0 * gram, 0.0)
    # sparse scatter of exp(-0.05*dist) onto in_adj.indices() == mask by adj != 0
    edge_p_ref[...] = jnp.where(adj != 0, jnp.exp(-0.05 * jnp.sqrt(dist2)), 0.0)

    # ---- k_estimate_net 'gcn-x-deg' ----
    g = jnp.maximum(rinv_row_ref[...] *
                    jnp.dot(adj, hkw_ref[...], preferred_element_type=f32), 0.0)
    # k_embed on concat([g, norm_deg]) == g @ Wx^T + norm_deg @ Wd^T + b
    e = _leaky(jnp.dot(g, WexT_ref[...], preferred_element_type=f32)
               + ndeg_row_ref[...] * WedT_ref[...] + bemb_ref[...])
    # fused LearnableKEncoder + unnormalization:  relu(e @ Wkf + bkf) + 1
    kk = jnp.dot(e, Wkf_ref[...], preferred_element_type=f32) + bkf_ref[...]
    k_ref[...] = jnp.maximum(kk, 0.0) + 1.0


# --------------------------------------------------------------------------
# Kernel C: select_top_k 'k_times_edge_prob' soft weighting.
#   out[i, c] = edge_p[i, c] * 0.5 * (1 - tanh(rank(c) - k_i))
# --------------------------------------------------------------------------
def topk_weight_kernel(p_ref, rank_ref, k_ref, out_ref):
    t = rank_ref[...].astype(jnp.float32)                              # int16/32 -> f32
    out_ref[...] = p_ref[...] * (0.5 * (1.0 - jnp.tanh(t - k_ref[...])))


# --------------------------------------------------------------------------
# Glue: descending-sort ranks (torch.sort has no Pallas primitive on TPU).
# Two stable vectorized row sorts; avoids the serialized N^2 scatter.
# --------------------------------------------------------------------------
def _ranks_desc(edge_p):
    idxs = jnp.argsort(-edge_p, axis=-1)                               # descending order
    return jnp.argsort(idxs, axis=-1)                                  # inverse permutation


# --------------------------------------------------------------------------
# Parameter init (deterministic, synthetic) and forward wrapper
# --------------------------------------------------------------------------
def init_params(key, in_dim=IN_DIM, latent=LATENT):
    ks = jax.random.split(key, 6)

    def lin(k, fan_in, fan_out, scale=0.1):
        kw, kb = jax.random.split(k)
        W = jax.random.normal(kw, (fan_out, fan_in), jnp.float32) * scale
        b = jax.random.normal(kb, (fan_out,), jnp.float32) * 0.01
        return W, b

    We, be = lin(ks[0], in_dim, latent)                 # node_encode_for_edges
    Wk, bk = lin(ks[1], in_dim, latent)                 # node_encode_for_k
    kW = jax.random.uniform(ks[2], (latent, latent), jnp.float32)   # torch.rand
    Wemb, bemb = lin(ks[3], latent + 1, latent // 2)    # k_embed (extra_k_dim = 1)
    Wmu, bmu = lin(ks[4], latent // 2, latent // 4)     # k_net.k_mu
    Wpj, bpj = lin(ks[5], latent // 4, 1)               # k_net.k_project
    return dict(We=We, be=be, Wk=Wk, bk=bk, kW=kW,
                Wemb=Wemb, bemb=bemb, Wmu=Wmu, bmu=bmu, Wpj=Wpj, bpj=bpj)


def dgg_forward(x, adj, params, *, tile_rows=512, topk_tile_rows=512,
                matmul_dtype=jnp.float32):
    N, in_dim = x.shape
    latent = params["We"].shape[0]
    half = latent // 2
    f32 = jnp.float32

    # -------- global degree statistics: cheap XLA reduces --------
    deg = jnp.sum(adj, axis=-1, keepdims=True)          # (N, 1)  in_adj.sum(-1)
    mu = jnp.mean(deg)
    std = jnp.std(deg, ddof=1)                          # unbiased std (torch .std())
    # matches PyTorch row_sum ** -0.5 (inf on isolated nodes; test graph has self-loops)
    rinv = jax.lax.rsqrt(deg)                           # (N, 1)
    norm_deg = (deg - mu) / (std + 1e-5)                # (N, 1)

    # -------- pre-transposed / fused weights (trace-time, tiny) --------
    WeT = params["We"].T
    be = params["be"].reshape(1, latent)
    WkT = params["Wk"].T
    bk = params["bk"].reshape(1, latent)
    kW = params["kW"]
    WexT = params["Wemb"][:, :latent].T                 # (latent, latent//2)
    WedT = params["Wemb"][:, latent:].T                 # (1, latent//2)
    bemb = params["bemb"].reshape(1, half)
    # fused k head:  relu(((e@Wmu^T+bmu)@Wpj^T+bpj)*std + mu) == relu(e@Wkf + bkf)
    WmuT = params["Wmu"].T
    WpjT = params["Wpj"].T
    Wkf = (WmuT @ WpjT) * std                                            # (half, 1)
    bkf = (params["bmu"].reshape(1, -1) @ WpjT
           + params["bpj"].reshape(1, 1)) * std + mu                     # (1, 1)

    # -------- VMEM-aware tile selection --------
    cap = _vmem_cap_bytes()
    budget = int(cap * 0.55)
    vmem_limit = int(cap * 0.7)
    align = 16 if N % 16 == 0 else 8
    fb = 2 if matmul_dtype == jnp.bfloat16 else 4        # bytes per matmul-stream element
    rank_dtype = jnp.int16 if N < 32768 else jnp.int32
    rb = jnp.dtype(rank_dtype).itemsize

    TA = _pick_tile(N, tile_rows, align=align, ensure_split=True)
    # Kernel B: double-buffered adj in + edge_p out dominate; residents fixed.
    fixed_b = 2 * (latent * N * fb) + 2 * (N * latent * fb) + 2 * (8 * N * 4) + (1 << 18)
    prow_b = 2 * N * fb + 2 * N * 4 + 2 * latent * fb + 10 * 128 * 4
    TB = _pick_tile(N, tile_rows, align=align, ensure_split=True,
                    per_row_bytes=prow_b, fixed_bytes=fixed_b, budget=budget)
    prow_c = 2 * N * (4 + rb + 4) + 2 * 128 * 4
    TC = _pick_tile(N, topk_tile_rows, align=align, ensure_split=True,
                    per_row_bytes=prow_c, fixed_bytes=(1 << 16), budget=budget)

    cp = pltpu.CompilerParams(dimension_semantics=("parallel",),
                              vmem_limit_bytes=vmem_limit)

    # ---------------- Kernel A: node encoders (lane-dense output) ----------------
    enc = pl.pallas_call(
        encode_kernel,
        out_shape=jax.ShapeDtypeStruct((N, 2 * latent), f32),
        grid=(N // TA,),
        in_specs=[pl.BlockSpec((TA, in_dim), lambda i: (i, 0)),
                  pl.BlockSpec((TA, 1), lambda i: (i, 0)),
                  _resident((in_dim, latent)), _resident((1, latent)),
                  _resident((in_dim, latent)), _resident((1, latent)),
                  _resident((latent, latent))],
        out_specs=pl.BlockSpec((TA, 2 * latent), lambda i: (i, 0)),
        compiler_params=cp,
    )(x, rinv, WeT, be, WkT, bk, kW)

    he = enc[:, :latent]                                 # (N, latent)
    hkw = enc[:, latent:]                                # rinv_j * (hk @ kW)
    hn2 = jnp.sum(jnp.square(he), axis=-1, keepdims=True)   # ||he_i||^2 (f32, exact)
    hn2_col = hn2.reshape(1, N)
    heT = he.T                                           # (latent, N) resident RHS

    # optional reduced-precision streams for the two big matmuls (f32 accumulate)
    he_s = he.astype(matmul_dtype)
    heT_s = heT.astype(matmul_dtype)
    hkw_s = hkw.astype(matmul_dtype)
    adj_s = adj if matmul_dtype == f32 else adj.astype(matmul_dtype)

    # ---------------- Kernel B: edge probs + k estimate (row tiled) ----------------
    edge_p, k = pl.pallas_call(
        dgg_main_kernel,
        out_shape=(jax.ShapeDtypeStruct((N, N), f32),
                   jax.ShapeDtypeStruct((N, 1), f32)),
        grid=(N // TB,),
        in_specs=[pl.BlockSpec((TB, N), lambda i: (i, 0)),        # adj rows (streamed)
                  pl.BlockSpec((TB, latent), lambda i: (i, 0)),   # he rows
                  _resident((latent, N)),                         # he^T (resident)
                  pl.BlockSpec((TB, 1), lambda i: (i, 0)),        # ||he_i||^2 rows
                  _resident((1, N)),                              # ||he_j||^2 cols
                  _resident((N, latent)),                         # rinv_j * (hk@kW)
                  pl.BlockSpec((TB, 1), lambda i: (i, 0)),        # rinv rows
                  pl.BlockSpec((TB, 1), lambda i: (i, 0)),        # norm_deg rows
                  _resident((latent, half)),
                  _resident((1, half)),
                  _resident((1, half)),
                  _resident((half, 1)),
                  _resident((1, 1))],
        out_specs=(pl.BlockSpec((TB, N), lambda i: (i, 0)),
                   pl.BlockSpec((TB, 1), lambda i: (i, 0))),
        compiler_params=cp,
    )(adj_s, he_s, heT_s, hn2, hn2_col, hkw_s, rinv, norm_deg,
      WexT, WedT, bemb, Wkf, bkf)

    # -------- glue: descending-sort ranks (two row sorts, no scatter) --------
    ranks = _ranks_desc(edge_p).astype(rank_dtype)

    # ---------------- Kernel C: soft top-k weighting (row tiled) ----------------
    out = pl.pallas_call(
        topk_weight_kernel,
        out_shape=jax.ShapeDtypeStruct((N, N), f32),
        grid=(N // TC,),
        in_specs=[pl.BlockSpec((TC, N), lambda i: (i, 0)),
                  pl.BlockSpec((TC, N), lambda i: (i, 0)),
                  pl.BlockSpec((TC, 1), lambda i: (i, 0))],
        out_specs=pl.BlockSpec((TC, N), lambda i: (i, 0)),
        compiler_params=cp,
    )(edge_p, ranks, k)

    # TODO(synk): .to_sparse() has no dense-JAX/Pallas equivalent; dense [N, N] returned.
    return out, edge_p, k


# --------------------------------------------------------------------------
# Pure-JAX reference (mirrors the PyTorch forward for the chosen args)
# --------------------------------------------------------------------------
def reference_forward(x, adj, params):
    N = x.shape[0]
    he = _leaky(x @ params["We"].T + params["be"])
    dist = jnp.sqrt(jnp.sum((he[:, None, :] - he[None, :, :]) ** 2, axis=-1))
    edge_p = jnp.where(adj != 0, jnp.exp(-0.05 * dist), 0.0)

    hk = _leaky(x @ params["Wk"].T + params["bk"])
    row_sum = adj.sum(-1)
    Dm = jnp.diag(jax.lax.rsqrt(row_sum))
    A_norm = Dm @ adj @ Dm
    g = jax.nn.relu(A_norm @ hk @ params["kW"])
    deg = row_sum.reshape(N, 1)
    mu = deg.mean()
    var = jnp.std(deg, ddof=1)
    norm_deg = (deg - mu) / (var + 1e-5)
    e = _leaky(jnp.concatenate([g, norm_deg], -1) @ params["Wemb"].T + params["bemb"])
    latent_k = e @ params["Wmu"].T + params["bmu"]
    kk = latent_k @ params["Wpj"].T + params["bpj"]
    k = jax.nn.relu(kk * var + mu) + 1.0

    ranks = _ranks_desc(edge_p).astype(jnp.float32)
    first_k = 1.0 - 0.5 * (1.0 + jnp.tanh(ranks - k))
    return edge_p * first_k, edge_p, k


if __name__ == "__main__":
    N = 256
    key = jax.random.PRNGKey(0)
    kx, ka, kv, kp = jax.random.split(key, 4)

    x = jax.random.normal(kx, (N, IN_DIM), jnp.float32)
    mask = (jax.random.uniform(ka, (N, N)) > 0.7).astype(jnp.float32)
    vals = jax.random.uniform(kv, (N, N), jnp.float32)
    in_adj = mask * vals + jnp.eye(N, dtype=jnp.float32)   # self loops -> row sums > 0

    params = init_params(kp)

    # ---------------- f32 path (matches PyTorch numerics) ----------------
    out, edge_p, k = dgg_forward(x, in_adj, params)
    out = jax.block_until_ready(out)

    ref_out, ref_edge_p, ref_k = reference_forward(x, in_adj, params)

    assert out.shape == (N, N) and out.dtype == jnp.float32
    assert bool(jnp.all(jnp.isfinite(out)))
    assert jnp.allclose(edge_p, ref_edge_p, atol=1e-3, rtol=1e-3), \
        float(jnp.max(jnp.abs(edge_p - ref_edge_p)))
    assert jnp.allclose(k, ref_k, atol=1e-3, rtol=1e-3), \
        float(jnp.max(jnp.abs(k - ref_k)))

    # top-k weighting stage checked against the reference formula with identical ranks/k
    ranks_f = _ranks_desc(edge_p).astype(jnp.float32)
    expected = edge_p * (1.0 - 0.5 * (1.0 + jnp.tanh(ranks_f - k)))
    assert jnp.allclose(out, expected, atol=1e-4, rtol=1e-4), \
        float(jnp.max(jnp.abs(out - expected)))

    # end-to-end: numerically tied edge probabilities may legitimately swap sort ranks
    # between the Gram-based kernel distances and the diff-based reference distances.
    mismatch = float(jnp.mean((jnp.abs(out - ref_out) > 1e-3).astype(jnp.float32)))
    assert mismatch < 1e-3, mismatch

    # ---------------- bf16 fast path (reduced-precision MXU streams) ----------------
    out_bf, edge_p_bf, k_bf = dgg_forward(x, in_adj, params, matmul_dtype=jnp.bfloat16)
    out_bf = jax.block_until_ready(out_bf)
    assert bool(jnp.all(jnp.isfinite(out_bf)))
    assert float(jnp.max(jnp.abs(edge_p_bf - ref_edge_p))) < 2e-2
    assert float(jnp.max(jnp.abs(k_bf - ref_k) / (jnp.abs(ref_k) + 1.0))) < 5e-2

    print("KERNEL_OK")
</pallas_src>

<mosaic_0001>
module attributes {stable_mosaic.version = 11 : i64} {
  func.func @encode_kernel(%arg0: i32, %arg1: memref<128x32xf32, #tpu.memory_space<vmem>>, %arg2: memref<128x1xf32, #tpu.memory_space<vmem>>, %arg3: memref<32x64xf32, #tpu.memory_space<vmem>>, %arg4: memref<1x64xf32, #tpu.memory_space<vmem>>, %arg5: memref<32x64xf32, #tpu.memory_space<vmem>>, %arg6: memref<1x64xf32, #tpu.memory_space<vmem>>, %arg7: memref<64x64xf32, #tpu.memory_space<vmem>>, %arg8: memref<128x128xf32, #tpu.memory_space<vmem>>) attributes {dimension_semantics = [#tpu.dimension_semantics<parallel>], iteration_bounds = array<i64: 2>, scalar_prefetch = 0 : i64, scratch_operands = 0 : i64, tpu.core_type = #tpu.core_type<tc>, window_params = [{transform_indices = @transform_0, window_bounds = array<i64: 128, 32>}, {transform_indices = @transform_1, window_bounds = array<i64: 128, 1>}, {pipeline_mode = #tpu.pipeline_mode<synchronous>, transform_indices = @transform_2, window_bounds = array<i64: 32, 64>}, {pipeline_mode = #tpu.pipeline_mode<synchronous>, transform_indices = @transform_3, window_bounds = array<i64: 1, 64>}, {pipeline_mode = #tpu.pipeline_mode<synchronous>, transform_indices = @transform_4, window_bounds = array<i64: 32, 64>}, {pipeline_mode = #tpu.pipeline_mode<synchronous>, transform_indices = @transform_5, window_bounds = array<i64: 1, 64>}, {pipeline_mode = #tpu.pipeline_mode<synchronous>, transform_indices = @transform_6, window_bounds = array<i64: 64, 64>}, {transform_indices = @transform_7, window_bounds = array<i64: 128, 128>}]} {
    %c0 = arith.constant 0 : index
    %c0_0 = arith.constant 0 : index
    %0 = vector.load %arg1[%c0, %c0_0] : memref<128x32xf32, #tpu.memory_space<vmem>>, vector<128x32xf32>
    %c0_1 = arith.constant 0 : index
    %c0_2 = arith.constant 0 : index
    %1 = vector.load %arg3[%c0_1, %c0_2] : memref<32x64xf32, #tpu.memory_space<vmem>>, vector<32x64xf32>
    %cst = arith.constant dense<0.000000e+00> : vector<128x64xf32>
    %2 = tpu.matmul %0, %1, %cst {dimension_numbers = #tpu.dot_dimension_numbers<[1], [0], [0], [1], [0, 0, 1, 1], [], []>} : vector<128x32xf32>, vector<32x64xf32>, vector<128x64xf32> -> vector<128x64xf32>
    %c0_3 = arith.constant 0 : index
    %c0_4 = arith.constant 0 : index
    %3 = vector.load %arg4[%c0_3, %c0_4] : memref<1x64xf32, #tpu.memory_space<vmem>>, vector<1x64xf32>
    %4 = vector.broadcast %3 : vector<1x64xf32> to vector<128x64xf32>
    %5 = arith.addf %2, %4 : vector<128x64xf32>
    %cst_5 = arith.constant 0.000000e+00 : f32
    %6 = vector.broadcast %cst_5 : f32 to vector<128x64xf32>
    %7 = arith.cmpf ogt, %5, %6 : vector<128x64xf32>
    %cst_6 = arith.constant 0.00999999977 : f32
    %8 = vector.broadcast %cst_6 : f32 to vector<128x64xf32>
    %9 = arith.mulf %8, %5 : vector<128x64xf32>
    %10 = arith.select %7, %5, %9 : vector<128x64xi1>, vector<128x64xf32>
    %c0_7 = arith.constant 0 : index
    %c0_8 = arith.constant 0 : index
    %11 = vector.load %arg5[%c0_7, %c0_8] : memref<32x64xf32, #tpu.memory_space<vmem>>, vector<32x64xf32>
    %cst_9 = arith.constant dense<0.000000e+00> : vector<128x64xf32>
    %12 = tpu.matmul %0, %11, %cst_9 {dimension_numbers = #tpu.dot_dimension_numbers<[1], [0], [0], [1], [0, 0, 1, 1], [], []>} : vector<128x32xf32>, vector<32x64xf32>, vector<128x64xf32> -> vector<128x64xf32>
    %c0_10 = arith.constant 0 : index
    %c0_11 = arith.constant 0 : index
    %13 = vector.load %arg6[%c0_10, %c0_11] : memref<1x64xf32, #tpu.memory_space<vmem>>, vector<1x64xf32>
    %14 = vector.broadcast %13 : vector<1x64xf32> to vector<128x64xf32>
    %15 = arith.addf %12, %14 : vector<128x64xf32>
    %cst_12 = arith.constant 0.000000e+00 : f32
    %16 = vector.broadcast %cst_12 : f32 to vector<128x64xf32>
    %17 = arith.cmpf ogt, %15, %16 : vector<128x64xf32>
    %cst_13 = arith.constant 0.00999999977 : f32
    %18 = vector.broadcast %cst_13 : f32 to vector<128x64xf32>
    %19 = arith.mulf %18, %15 : vector<128x64xf32>
    %20 = arith.select %17, %15, %19 : vector<128x64xi1>, vector<128x64xf32>
    %c0_14 = arith.constant 0 : index
    %c0_15 = arith.constant 0 : index
    %21 = vector.load %arg7[%c0_14, %c0_15] : memref<64x64xf32, #tpu.memory_space<vmem>>, vector<64x64xf32>
    %cst_16 = arith.constant dense<0.000000e+00> : vector<128x64xf32>
    %22 = tpu.matmul %20, %21, %cst_16 {dimension_numbers = #tpu.dot_dimension_numbers<[1], [0], [0], [1], [0, 0, 1, 1], [], []>} : vector<128x64xf32>, vector<64x64xf32>, vector<128x64xf32> -> vector<128x64xf32>
    %c0_17 = arith.constant 0 : index
    %c0_18 = arith.constant 0 : index
    %23 = vector.load %arg2[%c0_17, %c0_18] : memref<128x1xf32, #tpu.memory_space<vmem>>, vector<128x1xf32>
    %24 = vector.broadcast %23 : vector<128x1xf32> to vector<128x64xf32>
    %25 = arith.mulf %22, %24 : vector<128x64xf32>
    %26 = tpu.concatenate %10, %25 in 1 : vector<128x64xf32>, vector<128x64xf32> -> vector<128x128xf32>
    %c0_19 = arith.constant 0 : index
    %c0_20 = arith.constant 0 : index
    %27 = vector.load %arg8[%c0_19, %c0_20] : memref<128x128xf32, #tpu.memory_space<vmem>>, vector<128x128xf32>
    tpu.vector_store %arg8[%c0_19, %c0_20], %26 {strides = array<i32>} : memref<128x128xf32, #tpu.memory_space<vmem>>, vector<128x128xf32>,
    return
  }
  func.func @transform_0(%arg0: i32) -> (i32, i32) {
    %c0_i32 = arith.constant 0 : i32
    %c0_i32_0 = arith.constant 0 : i32
    return %arg0, %c0_i32 : i32, i32
  }
  func.func @transform_1(%arg0: i32) -> (i32, i32) {
    %c0_i32 = arith.constant 0 : i32
    %c0_i32_0 = arith.constant 0 : i32
    return %arg0, %c0_i32 : i32, i32
  }
  func.func @transform_2(%arg0: i32) -> (i32, i32) {
    %c0_i32 = arith.constant 0 : i32
    %c0_i32_0 = arith.constant 0 : i32
    %c0_i32_1 = arith.constant 0 : i32
    return %c0_i32, %c0_i32_0 : i32, i32
  }
  func.func @transform_3(%arg0: i32) -> (i32, i32) {
    %c0_i32 = arith.constant 0 : i32
    %c0_i32_0 = arith.constant 0 : i32
    %c0_i32_1 = arith.constant 0 : i32
    return %c0_i32, %c0_i32_0 : i32, i32
  }
  func.func @transform_4(%arg0: i32) -> (i32, i32) {
    %c0_i32 = arith.constant 0 : i32
    %c0_i32_0 = arith.constant 0 : i32
    %c0_i32_1 = arith.constant 0 : i32
    return %c0_i32, %c0_i32_0 : i32, i32
  }
  func.func @transform_5(%arg0: i32) -> (i32, i32) {
    %c0_i32 = arith.constant 0 : i32
    %c0_i32_0 = arith.constant 0 : i32
    %c0_i32_1 = arith.constant 0 : i32
    return %c0_i32, %c0_i32_0 : i32, i32
  }
  func.func @transform_6(%arg0: i32) -> (i32, i32) {
    %c0_i32 = arith.constant 0 : i32
    %c0_i32_0 = arith.constant 0 : i32
    %c0_i32_1 = arith.constant 0 : i32
    return %c0_i32, %c0_i32_0 : i32, i32
  }
  func.func @transform_7(%arg0: i32) -> (i32, i32) {
    %c0_i32 = arith.constant 0 : i32
    %c0_i32_0 = arith.constant 0 : i32
    return %arg0, %c0_i32 : i32, i32
  }
}

</mosaic_0001>

<bundles_post_ra>
// kernel: tpu_custom_call.1
= control target key start
LH: loop header
LB: loop body
LE: loop exit
PB: predicated region body
PF: predicated region fallthrough
CT: control target
= control target key end

     0   :  { %12 = vsyncpa [#allocation3], 0  ;;  %s1596_s0 = inlined_call_operand.vmem [shape: f32[256,32], index: 0, kind: input, shape index: {}]   ;;  %s1597_s1 = inlined_call_operand.vmem [shape: f32[256,1], index: 1, kind: input, shape index: {}]   ;;  %s1598_s2 = inlined_call_operand.vmem [shape: f32[32,64], index: 2, kind: input, shape index: {}]   ;;  %s1599_s3 = inlined_call_operand.vmem [shape: f32[1,64], index: 3, kind: input, shape index: {}]   ;;  %s1600_s4 = inlined_call_operand.vmem [shape: f32[32,64], index: 4, kind: input, shape index: {}]   ;;  %s1601_s5 = inlined_call_operand.vmem [shape: f32[1,64], index: 5, kind: input, shape index: {}]   ;;  %s1602_s6 = inlined_call_operand.vmem [shape: f32[64,64], index: 6, kind: input, shape index: {}]   ;;  %s1603_s7 = inlined_call_operand.hbm [shape: f32[256,128], index: 7, kind: output, shape index: {}]  }
   0x1   :  { %14 = vsyncpa [#allocation3 + $0x1], 0  ;;  %s1264_s24 = smov 0   ;;  %s1266_s25 = smov 0  }
   0x2   :  { %s1268_s26 = smov 0   ;;  %s1270_s27 = smov 0  }
   0x3 LB: > { %s1285_s28 = sadd.s32 4294967295, %s1218_s27   ;;  %s1029_s29 = sadd.s32 4294967294, %s1218_s27   ;;  %s1218_s27 = sphi %s1270_s27, %s1609_s27   ;;  %s1214_s26 = sphi %s1268_s26, %s1608_s26   ;;  %s1210_s25 = sphi %s1266_s25, %s1607_s25   ;;  %s1206_s24 = sphi %s1264_s24, %s1606_s24  }
   0x4   : > { %s1289_s30 = sadd.s32 1, %s1218_s27   ;;  %s184_s8 = sadd.s32 1, %s1214_s26 }
   0x5   : > { %s181_s9 = ssub.s32 %s1218_s27, %s1289_s30  ;;  %p194_p0 = scmp.ne.s32.totalorder %s1214_s26, %s1210_s25 }
   0x6   : > { %p182_p1 = scmp.eq.s32.totalorder %s181_s9, 0  ;;  %p195_p2 = scmp.eq.s32.totalorder %s1285_s28, 1 }
   0x7   : > { %p200_p3 = scmp.ne.s32.totalorder %s1210_s25, %s1206_s24  ;;  %p201_p4 = scmp.eq.s32.totalorder %s1029_s29, 1 }
   0x8   : > { %s1300_s10 = scalar_select %p182_p1, %s1214_s26, %s184_s8  }
   0x9   : > { %p1302_p5 = por %p195_p2, %p194_p0  ;;  %p1306_p6 = por %p201_p4, %p200_p3 }
   0xa   : > { %p1032_p7 = scmp.ge.s32.totalorder %s1218_s27, 1  ;;  %p252_p8 = scmp.lt.s32.totalorder %s1218_s27, 3 }
   0xc   : > { %p253_p9 = pnand %p1032_p7, %p252_p8 }
   0xd   : > { %s1034_s17 = sshll.u32 (!%p253_p9), %s1285_s28, 4  ;;  %s286_s20 = sand.u32 (!%p253_p9), 1, %s1210_s25  }
   0xe   : > { %256 = sbr.rel (%p253_p9) target bundleno = 532 (0x214), region = 48  ;;  %p290_p10 = scmp.lt.s32.totalorder (!%p253_p9), %s1034_s17, 31 }
   0xf   : > { %s1033_s21 = sshll.u32 (!%p253_p9), %s286_s20, 7  ;;  %s1091_s29 = sshll.u32 (!%p253_p9), %s1285_s28, 7 }
  0x10   : > { %s1508_s23 = scalar_lea.vmem (!%p253_p9), [#allocation2], %s1033_s21  ;;  %s940_s28 = scalar_lea.sflag (!%p253_p9), [#allocation3], %s286_s20 }
  0x11   : > { %s952_s14 = sshll.u32 (!%p253_p9), %s1508_s23, 4  ;;  %s1176_s19 = scalar_lea.hbm (!%p253_p9), %s1603_s7, 256  ;;  %s953_s14 = int_to_ptr.vmem [resolvable:$true] %s952_s14 }
  0x13   : > { %v491_v0 = vld [vmem:[%s1600_s4 + $0x18] sm:$0xff]  ;;  %v490_v1 = vld [vmem:[%s1600_s4 + $0x10] sm:$0xff]  ;;  %v489_v2 = vld [vmem:[%s1600_s4 + $0x8] sm:$0xff]  ;;  %s1611_s17 = smov (!%p290_p10, %s1034_s17), 31  ;;  %vm326_vm0 = vcmask 261120   ;;  %v1220_v32 = vmov 0  }
  0x14   : > { %508 = vmatpush.msra.mxu1 %v491_v0  ;;  %v488_v3 = vld [vmem:[%s1600_s4] sm:$0xff]  ;;  %s1035_s22 = sshll.u32 %s1611_s17, 3  ;;  %v321_v9 = vld [vmem:[%s1598_s2 + $0x18] sm:$0xff]  ;;  %v320_v10 = vld [vmem:[%s1598_s2 + $0x10] sm:$0xff]  ;;  %1151 = vset.pattern.permute.xlu0 %v1220_v32  ;;  %vm617_vm2 = vcmask 523264   ;;  %s1221_s17 = smov 64  }
  0x15   : > { %s1333_s8 = scalar_lea.vmem %s1596_s0, %s1035_s22  ;;  %1092 = vmatpush.msra.mxu3 %v321_v9  ;;  %387 = vmatpush.msra.mxu0 %v321_v9  ;;  %v319_v11 = vld [vmem:[%s1598_s2 + $0x8] sm:$0xff]  ;;  %v318_v12 = vld [vmem:[%s1598_s2] sm:$0xff]  ;;  %v616_v20 = vld [vmem:[%s1602_s6 + $0x38] sm:$0xff]  ;;  %s1420_s15 = scalar_lea.vmem %s1597_s1, %s1035_s22 }
  0x16   : > { %509 = vmatpush.msra.mxu1 %v490_v1  ;;  %v302_v4 = vld [vmem:[%s1333_s8] sm:$0xff]  ;;  %v303_v5 = vld [vmem:[%s1333_s8 + $0x8] sm:$0xff]  ;;  %v304_v6 = vld [vmem:[%s1333_s8 + $0x10] sm:$0xff]  ;;  %674 = vmatpush.msra.mxu2 %v616_v20 }
  0x17   : > { %v305_v7 = vld [vmem:[%s1333_s8 + $0x18] sm:$0xff]  ;;  %v306_v8 = vld [vmem:[%s1333_s8 + $0x20] sm:$0xff]  ;;  %1093 = vmatpush.msra.mxu3 %v320_v10  ;;  %388 = vmatpush.msra.mxu0 %v320_v10  ;;  %v307_v13 = vld [vmem:[%s1333_s8 + $0x28] sm:$0xff] }
  0x18   : > { %510 = vmatpush.msra.mxu1 %v489_v2  ;;  %v315_v14 = vld [vmem:[%s1333_s8 + $0x68] sm:$0xff]  ;;  %v308_v15 = vld [vmem:[%s1333_s8 + $0x30] sm:$0xff]  ;;  %v309_v17 = vld [vmem:[%s1333_s8 + $0x38] sm:$0xff]  ;;  %1152 = vset.pattern.permute.xlu1 %v1220_v32 }
  0x19   : > { %1094 = vmatpush.msra.mxu3 %v319_v11  ;;  %389 = vmatpush.msra.mxu0 %v319_v11  ;;  %v316_v16 = vld [vmem:[%s1333_s8 + $0x70] sm:$0xff]  ;;  %v317_v18 = vld [vmem:[%s1333_s8 + $0x78] sm:$0xff]  ;;  %v310_v19 = vld [vmem:[%s1333_s8 + $0x40] sm:$0xff] }
  0x1a   : > { %511 = vmatpush.msra.mxu1 %v488_v3  ;;  %v615_v21 = vld [vmem:[%s1602_s6 + $0x30] sm:$0xff]  ;;  %v614_v22 = vld [vmem:[%s1602_s6 + $0x28] sm:$0xff]  ;;  %v613_v23 = vld [vmem:[%s1602_s6 + $0x20] sm:$0xff]  ;;  %1153 = vset.pattern.permute.xlu2 %v1220_v32 }
  0x1b   : > { %1054 = vmatmul.msk.f32.vlgmr.msra.gmra.mxu1 %vm326_vm0, %v302_v4  ;;  %1095 = vmatpush.msra.mxu3 %v318_v12  ;;  %v311_v24 = vld [vmem:[%s1333_s8 + $0x48] sm:$0xff]  ;;  %v612_v25 = vld [vmem:[%s1602_s6 + $0x18] sm:$0xff]  ;;  %v312_v26 = vld [vmem:[%s1333_s8 + $0x50] sm:$0xff] }
  0x1c   : > { %390 = vmatpush.msra.mxu0 %v318_v12  ;;  %1051 = vmatmul.msk.f32.vlgmr.msra.gmra.mxu3 %vm326_vm0, %v315_v14  ;;  %v313_v27 = vld [vmem:[%s1333_s8 + $0x58] sm:$0xff]  ;;  %v314_v28 = vld [vmem:[%s1333_s8 + $0x60] sm:$0xff]  ;;  %v611_v29 = vld [vmem:[%s1602_s6 + $0x10] sm:$0xff]  ;;  %s951_s8 = scalar_lea.hbm %s1603_s7, %s1091_s29 }
  0x1d   : > { %1096 = vmatpush.msrb.mxu3 %v491_v0  ;;  %1038 = vmatmul.msk.f32.vlgmr.msra.gmra.mxu0 %vm326_vm0, %v302_v4  ;;  %v610_v30 = vld [vmem:[%s1602_s6 + $0x8] sm:$0xff]  ;;  %v609_v31 = vld [vmem:[%s1602_s6] sm:$0xff]  ;;  %v733_v40 = vld [vmem:[%s1420_s15 + $0x10] sm:$0xff] }
  0x1e   : > { %675 = vmatpush.msra.mxu2 %v615_v21  ;;  %v731_v33 = vld [vmem:[%s1420_s15] sm:$0xff]  ;;  %v732_v35 = vld [vmem:[%s1420_s15 + $0x8] sm:$0xff]  ;;  %759 = vperm.xlu1 %1152, %v733_v40   ;;  %v734_v45 = vld [vmem:[%s1420_s15 + $0x18] sm:$0xff] }
  0x1f   : > { %1097 = vmatpush.msrb.mxu3 %v490_v1  ;;  %749 = vperm.xlu0 %1151, %v731_v33   ;;  %v1427_v34 = vld [vmem:[%s1601_s5] ss:$0 sm:$0xff]  ;;  %v737_v58 = vld [vmem:[%s1420_s15 + $0x30] sm:$0xff]  ;;  %v738_v0 = vld [vmem:[%s1420_s15 + $0x38] sm:$0xff] }
  0x20   : > { %676 = vmatpush.msra.mxu2 %v614_v22  ;;  %v735_v63 = vld [vmem:[%s1420_s15 + $0x20] sm:$0xff]  ;;  %v741_v11 = vld [vmem:[%s1420_s15 + $0x50] sm:$0xff] }
  0x21   : > { %1098 = vmatpush.msrb.mxu3 %v489_v2  ;;  %769 = vperm.xlu2 %1153, %v735_v63   ;;  %v743_v12 = vld [vmem:[%s1420_s15 + $0x60] sm:$0xff] }
  0x22   : > { %677 = vmatpush.msra.mxu2 %v613_v23 }
  0x23   : > { %1055 = vmatmul.msk.f32.gmra.mxu1 %vm326_vm0, %v303_v5  ;;  %1099 = vmatpush.msrb.mxu3 %v488_v3 }
  0x24   : > { %1052 = vmatmul.msk.f32.gmra.mxu3 %vm326_vm0, %v316_v16  ;;  %678 = vmatpush.msra.mxu2 %v612_v25 }
  0x25   : > { %1039 = vmatmul.msk.f32.gmra.mxu0 %vm326_vm0, %v303_v5  ;;  %1100 = vmatpush.msra.mxu3 %v616_v20  ;;  %v736_v5 = vld [vmem:[%s1420_s15 + $0x28] sm:$0xff] }
  0x26   : > { %679 = vmatpush.msra.mxu2 %v611_v29  ;;  %764 = vperm.xlu1 %1152, %v734_v45  }
  0x27   : > { %1101 = vmatpush.msra.mxu3 %v615_v21  ;;  %754 = vperm.xlu0 %1151, %v732_v35  }
  0x28   : > { %680 = vmatpush.msra.mxu2 %v610_v30 }
  0x29   : > { %1102 = vmatpush.msra.mxu3 %v614_v22  ;;  %774 = vperm.xlu2 %1153, %v736_v5  }
  0x2a   : > { %681 = vmatpush.msra.mxu2 %v609_v31 }
  0x2b   : > { %1056 = vmatmul.msk.f32.gmra.mxu1 %vm326_vm0, %v304_v6  ;;  %1103 = vmatpush.msra.mxu3 %v613_v23 }
  0x2c   : > { %1053 = vmatmul.msk.f32.gmra.mxu3 %vm326_vm0, %v317_v18 }
  0x2d   : > { %1040 = vmatmul.msk.f32.gmra.mxu0 %vm326_vm0, %v304_v6  ;;  %1104 = vmatpush.msra.mxu3 %v612_v25  ;;  %v740_v6 = vld [vmem:[%s1420_s15 + $0x48] sm:$0xff]  ;;  %v739_v25 = vld [vmem:[%s1420_s15 + $0x40] sm:$0xff] }
  0x2e   : > { %784 = vperm.xlu1 %1152, %v738_v0  }
  0x2f   : > { %1105 = vmatpush.msra.mxu3 %v611_v29  ;;  %779 = vperm.xlu0 %1151, %v737_v58  }
  0x31   : > { %1106 = vmatpush.msra.mxu3 %v610_v30  ;;  %789 = vperm.xlu2 %1153, %v739_v25  }
  0x33   : > { %1057 = vmatmul.msk.f32.gmra.mxu1 %vm326_vm0, %v305_v7  ;;  %1107 = vmatpush.msra.mxu3 %v609_v31 }
  0x34   : > { %1067 = vmatmul.msk.f32.vlgmr.msrb.gmra.mxu3 %vm326_vm0, %v315_v14 }
  0x35   : > { %1041 = vmatmul.msk.f32.gmra.mxu0 %vm326_vm0, %v305_v7 }
  0x36   : > { %799 = vperm.xlu1 %1152, %v741_v11  }
  0x37   : > { %794 = vperm.xlu0 %1151, %v740_v6  }
  0x3b   : > { %1058 = vmatmul.msk.f32.gmra.mxu1 %vm326_vm0, %v306_v8 }
  0x3c   : > { %1068 = vmatmul.msk.f32.gmra.mxu3 %vm326_vm0, %v316_v16 }
  0x3d   : > { %1042 = vmatmul.msk.f32.gmra.mxu0 %vm326_vm0, %v306_v8 }
  0x3f   : > { %809 = vperm.xlu0 %1151, %v743_v12  }
  0x43   : > { %1059 = vmatmul.msk.f32.gmra.mxu1 %vm326_vm0, %v307_v13 }
  0x44   : > { %1069 = vmatmul.msk.f32.gmra.mxu3 %vm326_vm0, %v317_v18  ;;  %v744_v18 = vld [vmem:[%s1420_s15 + $0x68] sm:$0xff] }
  0x45   : > { %1043 = vmatmul.msk.f32.gmra.mxu0 %vm326_vm0, %v307_v13  ;;  %814 = vperm.xlu1 %1152, %v744_v18  }
  0x4b   : > { %1060 = vmatmul.msk.f32.gmra.mxu1 %vm326_vm0, %v308_v15 }
  0x4d   : > { %1044 = vmatmul.msk.f32.gmra.mxu0 %vm326_vm0, %v308_v15 }
  0x53   : > { %1061 = vmatmul.msk.f32.gmra.mxu1 %vm326_vm0, %v309_v17 }
  0x55   : > { %1045 = vmatmul.msk.f32.gmra.mxu0 %vm326_vm0, %v309_v17 }
  0x5b   : > { %1062 = vmatmul.msk.f32.gmra.mxu1 %vm326_vm0, %v310_v19 }
  0x5d   : > { %1046 = vmatmul.msk.f32.gmra.mxu0 %vm326_vm0, %v310_v19  ;;  %v746_v19 = vld [vmem:[%s1420_s15 + $0x78] sm:$0xff] }
  0x5e   : > { %824 = vperm.xlu0 %1151, %v746_v19  }
  0x63   : > { %1063 = vmatmul.msk.f32.gmra.mxu1 %vm326_vm0, %v311_v24 }
  0x65   : > { %1047 = vmatmul.msk.f32.gmra.mxu0 %vm326_vm0, %v311_v24 }
  0x6b   : > { %1064 = vmatmul.msk.f32.gmra.mxu1 %vm326_vm0, %v312_v26 }
  0x6d   : > { %1048 = vmatmul.msk.f32.gmra.mxu0 %vm326_vm0, %v312_v26 }
  0x73   : > { %1065 = vmatmul.msk.f32.gmra.mxu1 %vm326_vm0, %v313_v27 }
  0x75   : > { %1049 = vmatmul.msk.f32.gmra.mxu0 %vm326_vm0, %v313_v27 }
  0x7b   : > { %1066 = vmatmul.msk.f32.gmra.mxu1 %vm326_vm0, %v314_v28 }
  0x7d   : > { %1050 = vmatmul.msk.f32.gmra.mxu0 %vm326_vm0, %v314_v28 }
  0x98   : > { %v513_v36 = vpop.f32.mrf.mxu1 }
  0x99   : > { %v514_v37 = vadd.f32 %v1427_v34, %v513_v36 }
  0x9b   : > { %v577_v38 = vmul.f32 0.01, %v514_v37  ;;  %vm561_vm1 = vcmp.gt.f32.partialorder %v514_v37, 0.0 }
  0x9d   : > { %v593_v39 = vsel %vm561_vm1, %v514_v37, %v577_v38  ;;  %v742_v37 = vld [vmem:[%s1420_s15 + $0x58] sm:$0xff] }
  0x9e   : > { %1070 = vmatmul.msk.f32.vlgmr.msra.gmra.mxu2 %vm617_vm2, %v593_v39  ;;  %804 = vperm.xlu2 %1153, %v742_v37  }
  0x9f   : > { %v1458_v14 = vpop.f32.mrf.mxu3 }
  0xa0   : > { %v516_v41 = vpop.f32.mrf.mxu1 }
  0xa1   : > { %v517_v42 = vadd.f32 %v1427_v34, %v516_v41  ;;  %v745_v41 = vld [vmem:[%s1420_s15 + $0x70] sm:$0xff]  ;;  %s954_s15 = sshll.u32 %s951_s8, 4  ;;  %s955_s15 = int_to_ptr.hbm [resolvable:$true] %s954_s15 }
  0xa2   : > { %s1170_s16 = sshra.s32 %s955_s15, 4  ;;  %s1171_s16 = int_to_ptr.hbm [resolvable:$true] %s1170_s16 }
  0xa3   : > { %v578_v43 = vmul.f32 0.01, %v517_v42  ;;  %vm562_vm3 = vcmp.gt.f32.partialorder %v517_v42, 0.0  ;;  %s1172_s18 = scalar_lea.hbm %s1171_s16, 128  ;;  %p1177_p0 = scmp.lt.s32.totalorder %s1171_s16, %s1603_s7 }
  0xa4   : > { %p1173_p11 = scmp.ne.s32.totalorder %s1171_s16, %s1172_s18  ;;  %p1178_p1 = scmp.lt.s32.totalorder %s1176_s19, %s1172_s18 }
  0xa5   : > { %v594_v44 = vsel %vm562_vm3, %v517_v42, %v578_v43 }
  0xa6   : > { %1071 = vmatmul.msk.f32.gmra.mxu2 %vm617_vm2, %v594_v44  ;;  %819 = vperm.xlu2 %1153, %v745_v41   ;;  %p1174_p12 = pnand %p1173_p11, %p1302_p5  ;;  %p1179_p2 = por %p1178_p1, %p1177_p0 }
  0xa7   : > { %v1465_v22 = vpop.f32.mrf.mxu3 }
  0xa8   : > { %v519_v46 = vpop.f32.mrf.mxu1  ;;  %p1175_p13 = pneg %p1174_p12 }
  0xa9   : > { %v520_v47 = vadd.f32 %v1427_v34, %v519_v46 }
  0xaa   : > { %p1180_p3 = pnand %p1179_p2, %p1175_p13 }
  0xab   : > { %v579_v48 = vmul.f32 0.01, %v520_v47  ;;  %vm563_vm4 = vcmp.gt.f32.partialorder %v520_v47, 0.0 }
  0xad   : > { %v595_v49 = vsel %vm563_vm4, %v520_v47, %v579_v48 }
  0xae   : > { %1072 = vmatmul.msk.f32.gmra.mxu2 %vm617_vm2, %v595_v49 }
  0xaf   : > { %v1470_v29 = vpop.f32.mrf.mxu3 }
  0xb0   : > { %v522_v50 = vpop.f32.mrf.mxu1 }
  0xb1   : > { %v523_v51 = vadd.f32 %v1427_v34, %v522_v50 }
  0xb3   : > { %v580_v52 = vmul.f32 0.01, %v523_v51  ;;  %vm564_vm5 = vcmp.gt.f32.partialorder %v523_v51, 0.0 }
  0xb5   : > { %v596_v53 = vsel %vm564_vm5, %v523_v51, %v580_v52 }
  0xb6   : > { %1073 = vmatmul.msk.f32.gmra.mxu2 %vm617_vm2, %v596_v53 }
  0xb7   : > { %v552_v36 = vpop.f32.mrf.mxu3 }
  0xb8   : > { %v525_v54 = vpop.f32.mrf.mxu1  ;;  %v553_v43 = vadd.f32 %v1427_v34, %v552_v36 }
  0xb9   : > { %v526_v55 = vadd.f32 %v1427_v34, %v525_v54  ;;  %v750_v54 = vpop.permute.xlu0 %749 }
  0xba   : > { %v590_v45 = vmul.f32 0.01, %v553_v43  ;;  %vm574_vm15 = vcmp.gt.f32.partialorder %v553_v43, 0.0 }
  0xbb   : > { %v581_v56 = vmul.f32 0.01, %v526_v55  ;;  %vm565_vm6 = vcmp.gt.f32.partialorder %v526_v55, 0.0 }
  0xbc   : > { %v606_v47 = vsel %vm574_vm15, %v553_v43, %v590_v45 }
  0xbd   : > { %v597_v57 = vsel %vm565_vm6, %v526_v55, %v581_v56 }
  0xbe   : > { %1074 = vmatmul.msk.f32.gmra.mxu2 %vm617_vm2, %v597_v57 }
  0xbf   : > { %v555_v44 = vpop.f32.mrf.mxu3 }
  0xc0   : > { %v528_v59 = vpop.f32.mrf.mxu1  ;;  %v556_v46 = vadd.f32 %v1427_v34, %v555_v44 }
  0xc1   : > { %v529_v60 = vadd.f32 %v1427_v34, %v528_v59  ;;  %v755_v57 = vpop.permute.xlu0 %754 }
  0xc2   : > { %v591_v48 = vmul.f32 0.01, %v556_v46  ;;  %vm575_vm0 = vcmp.gt.f32.partialorder %v556_v46, 0.0 }
  0xc3   : > { %v582_v61 = vmul.f32 0.01, %v529_v60  ;;  %vm566_vm7 = vcmp.gt.f32.partialorder %v529_v60, 0.0 }
  0xc4   : > { %v607_v51 = vsel %vm575_vm0, %v556_v46, %v591_v48 }
  0xc5   : > { %v598_v62 = vsel %vm566_vm7, %v529_v60, %v582_v61 }
  0xc6   : > { %1075 = vmatmul.msk.f32.gmra.mxu2 %vm617_vm2, %v598_v62 }
  0xc7   : > { %v558_v49 = vpop.f32.mrf.mxu3 }
  0xc8   : > { %v531_v1 = vpop.f32.mrf.mxu1  ;;  %v559_v50 = vadd.f32 %v1427_v34, %v558_v49 }
  0xc9   : > { %v532_v2 = vadd.f32 %v1427_v34, %v531_v1  ;;  %v770_v1 = vpop.permute.xlu2 %769 }
  0xca   : > { %v592_v52 = vmul.f32 0.01, %v559_v50  ;;  %vm576_vm1 = vcmp.gt.f32.partialorder %v559_v50, 0.0 }
  0xcb   : > { %v583_v3 = vmul.f32 0.01, %v532_v2  ;;  %vm567_vm8 = vcmp.gt.f32.partialorder %v532_v2, 0.0 }
  0xcc   : > { %v608_v53 = vsel %vm576_vm1, %v559_v50, %v592_v52 }
  0xcd   : > { %v599_v4 = vsel %vm567_vm8, %v532_v2, %v583_v3 }
  0xce   : > { %1076 = vmatmul.msk.f32.gmra.mxu2 %vm617_vm2, %v599_v4 }
  0xd0   : > { %v534_v7 = vpop.f32.mrf.mxu1 }
  0xd1   : > { %v535_v8 = vadd.f32 %v1427_v34, %v534_v7  ;;  %v775_v4 = vpop.permute.xlu2 %774  ;;  %v780_v7 = vpop.permute.xlu0 %779 }
  0xd3   : > { %v584_v9 = vmul.f32 0.01, %v535_v8  ;;  %vm568_vm9 = vcmp.gt.f32.partialorder %v535_v8, 0.0 }
  0xd5   : > { %v600_v10 = vsel %vm568_vm9, %v535_v8, %v584_v9 }
  0xd6   : > { %1077 = vmatmul.msk.f32.gmra.mxu2 %vm617_vm2, %v600_v10 }
  0xd8   : > { %v537_v13 = vpop.f32.mrf.mxu1 }
  0xd9   : > { %v538_v15 = vadd.f32 %v1427_v34, %v537_v13  ;;  %v392_v13 = vpop.f32.mrf.mxu0  ;;  %v795_v19 = vpop.permute.xlu0 %794 }
  0xdb   : > { %v585_v16 = vmul.f32 0.01, %v538_v15  ;;  %vm569_vm10 = vcmp.gt.f32.partialorder %v538_v15, 0.0 }
  0xdd   : > { %v601_v17 = vsel %vm569_vm10, %v538_v15, %v585_v16  ;;  %v790_v15 = vpop.permute.xlu2 %789 }
  0xde   : > { %1078 = vmatmul.msk.f32.gmra.mxu2 %vm617_vm2, %v601_v17 }
  0xe0   : > { %v540_v20 = vpop.f32.mrf.mxu1 }
  0xe1   : > { %v541_v21 = vadd.f32 %v1427_v34, %v540_v20  ;;  %v395_v18 = vpop.f32.mrf.mxu0  ;;  %v810_v37 = vpop.permute.xlu0 %809 }
  0xe3   : > { %v586_v23 = vmul.f32 0.01, %v541_v21  ;;  %vm570_vm11 = vcmp.gt.f32.partialorder %v541_v21, 0.0 }
  0xe5   : > { %v602_v24 = vsel %vm570_vm11, %v541_v21, %v586_v23 }
  0xe6   : > { %1079 = vmatmul.msk.f32.gmra.mxu2 %vm617_vm2, %v602_v24 }
  0xe8   : > { %v543_v26 = vpop.f32.mrf.mxu1 }
  0xe9   : > { %v544_v27 = vadd.f32 %v1427_v34, %v543_v26  ;;  %v398_v25 = vpop.f32.mrf.mxu0 }
  0xeb   : > { %v587_v28 = vmul.f32 0.01, %v544_v27  ;;  %vm571_vm12 = vcmp.gt.f32.partialorder %v544_v27, 0.0 }
  0xed   : > { %v603_v30 = vsel %vm571_vm12, %v544_v27, %v587_v28 }
  0xee   : > { %1080 = vmatmul.msk.f32.gmra.mxu2 %vm617_vm2, %v603_v30  ;;  %v1499_v30 = vld [vmem:[%s1599_s3] ss:$0 sm:$0xff] }
  0xf0   : > { %v546_v31 = vpop.f32.mrf.mxu1 }
  0xf1   : > { %v547_v32 = vadd.f32 %v1427_v34, %v546_v31 }
  0xf3   : > { %v588_v33 = vmul.f32 0.01, %v547_v32  ;;  %vm572_vm13 = vcmp.gt.f32.partialorder %v547_v32, 0.0 }
  0xf5   : > { %v604_v35 = vsel %vm572_vm13, %v547_v32, %v588_v33  ;;  %v401_v32 = vpop.f32.mrf.mxu0  ;;  %v396_v33 = vadd.f32 %v1499_v30, %v395_v18 }
  0xf6   : > { %1081 = vmatmul.msk.f32.gmra.mxu2 %vm617_vm2, %v604_v35 }
  0xf7   : > { %v457_v36 = vmul.f32 0.01, %v396_v33  ;;  %vm441_vm3 = vcmp.gt.f32.partialorder %v396_v33, 0.0 }
  0xf8   : > { %v549_v38 = vpop.f32.mrf.mxu1  ;;  %v805_v27 = vpop.permute.xlu2 %804 }
  0xf9   : > { %v550_v39 = vadd.f32 %v1427_v34, %v549_v38  ;;  %v760_v34 = vpop.permute.xlu1 %759 }
  0xfb   : > { %vm573_vm14 = vcmp.gt.f32.partialorder %v550_v39, 0.0  ;;  %v589_v40 = vmul.f32 0.01, %v550_v39 }
  0xfd   : > { %v605_v42 = vsel %vm573_vm14, %v550_v39, %v589_v40  ;;  %v473_v40 = vsel %vm441_vm3, %v396_v33, %v457_v36  ;;  %v404_v41 = vpop.f32.mrf.mxu0 }
  0xfe   : > { %1082 = vmatmul.msk.f32.vlgmr.msra.gmra.mxu3 %vm617_vm2, %v605_v42 }
 0x100   : > { %v820_v35 = vpop.permute.xlu2 %819 }
 0x101   : > { %v765_v62 = vpop.permute.xlu1 %764 }
 0x105   : > { %v407_v48 = vpop.f32.mrf.mxu0 }
 0x106   : > { %1083 = vmatmul.msk.f32.gmra.mxu3 %vm617_vm2, %v606_v47  ;;  %v393_v47 = vadd.f32 %v1499_v30, %v392_v13  ;;  %v408_v13 = vadd.f32 %v1499_v30, %v407_v48 }
 0x108   : > { %v456_v49 = vmul.f32 0.01, %v393_v47  ;;  %vm440_vm4 = vcmp.gt.f32.partialorder %v393_v47, 0.0  ;;  %vm445_vm9 = vcmp.gt.f32.partialorder %v408_v13, 0.0 }
 0x109   : > { %v785_v10 = vpop.permute.xlu1 %784 }
 0x10a   : > { %v472_v52 = vsel %vm440_vm4, %v393_v47, %v456_v49 }
 0x10e   : > { %1084 = vmatmul.msk.f32.gmra.mxu3 %vm617_vm2, %v607_v51 }
 0x111   : > { %v800_v23 = vpop.permute.xlu1 %799 }
 0x116   : > { %1085 = vmatmul.msk.f32.gmra.mxu3 %vm617_vm2, %v608_v53  ;;  %v405_v53 = vadd.f32 %v1499_v30, %v404_v41 }
 0x118   : > { %vm444_vm5 = vcmp.gt.f32.partialorder %v405_v53, 0.0 }
 0x119   : > { %v815_v44 = vpop.permute.xlu1 %814 }
 0x121   : > { %v683_v55 = vpop.f32.mrf.mxu2 }
 0x122   : > { %v827_v56 = vmul.f32 %v750_v54, %v683_v55 }
 0x124   : > { %859 = vrot.lane.b32.xlu1 %v827_v56, %s1221_s17  ;;  %v825_v56 = vpop.permute.xlu0 %824 }
 0x129   : > { %v686_v58 = vpop.f32.mrf.mxu2 }
 0x12a   : > { %v828_v59 = vmul.f32 %v755_v57, %v686_v58  ;;  %v460_v57 = vmul.f32 0.01, %v405_v53 }
 0x12c   : > { %861 = vrot.lane.b32.xlu2 %v828_v59, %s1221_s17  ;;  %v410_v59 = vpop.f32.mrf.mxu0 }
 0x131   : > { %v689_v60 = vpop.f32.mrf.mxu2 }
 0x132   : > { %v829_v61 = vmul.f32 %v760_v34, %v689_v60  ;;  %v399_v60 = vadd.f32 %v1499_v30, %v398_v25 }
 0x134   : > { %863 = vrot.lane.b32.xlu0 %v829_v61, %s1221_s17  ;;  %v476_v61 = vsel %vm444_vm5, %v405_v53, %v460_v57  ;;  %vm442_vm6 = vcmp.gt.f32.partialorder %v399_v60, 0.0 }
 0x139   : > { %v692_v63 = vpop.f32.mrf.mxu2 }
 0x13a   : > { %v830_v0 = vmul.f32 %v765_v62, %v692_v63 }
 0x13c   : > { %865 = vrot.lane.b32.xlu1 %v830_v0, %s1221_s17  ;;  %v458_v0 = vmul.f32 0.01, %v399_v60 }
 0x141   : > { %v695_v2 = vpop.f32.mrf.mxu2 }
 0x142   : > { %v831_v3 = vmul.f32 %v770_v1, %v695_v2  ;;  %v413_v1 = vpop.f32.mrf.mxu0  ;;  %v402_v2 = vadd.f32 %v1499_v30, %v401_v32 }
 0x144   : > { %867 = vrot.lane.b32.xlu2 %v831_v3, %s1221_s17  ;;  %v474_v3 = vsel %vm442_vm6, %v399_v60, %v458_v0  ;;  %vm443_vm7 = vcmp.gt.f32.partialorder %v402_v2, 0.0 }
 0x149   : > { %v698_v5 = vpop.f32.mrf.mxu2 }
 0x14a   : > { %v832_v6 = vmul.f32 %v775_v4, %v698_v5 }
 0x14c   : > { %869 = vrot.lane.b32.xlu0 %v832_v6, %s1221_s17  ;;  %v459_v6 = vmul.f32 0.01, %v402_v2 }
 0x151   : > { %v701_v8 = vpop.f32.mrf.mxu2 }
 0x152   : > { %v833_v9 = vmul.f32 %v780_v7, %v701_v8  ;;  %v475_v7 = vsel %vm443_vm7, %v402_v2, %v459_v6  ;;  %v414_v8 = vadd.f32 %v1499_v30, %v413_v1  ;;  %v438_v1 = vadd.f32 %v1499_v30, %v1470_v29 }
 0x154   : > { %871 = vrot.lane.b32.xlu1 %v833_v9, %s1221_s17  ;;  %v416_v9 = vpop.f32.mrf.mxu0  ;;  %vm447_vm8 = vcmp.gt.f32.partialorder %v414_v8, 0.0  ;;  %vm455_vm3 = vcmp.gt.f32.partialorder %v438_v1, 0.0 }
 0x159   : > { %v704_v11 = vpop.f32.mrf.mxu2 }
 0x15a   : > { %v834_v12 = vmul.f32 %v785_v10, %v704_v11 }
 0x15c   : > { %873 = vrot.lane.b32.xlu2 %v834_v12, %s1221_s17  ;;  %v463_v12 = vmul.f32 0.01, %v414_v8  ;;  %v419_v18 = vpop.f32.mrf.mxu0 }
 0x161   : > { %v707_v16 = vpop.f32.mrf.mxu2 }
 0x162   : > { %v835_v17 = vmul.f32 %v790_v15, %v707_v16  ;;  %v479_v15 = vsel %vm447_vm8, %v414_v8, %v463_v12 }
 0x164   : > { %875 = vrot.lane.b32.xlu0 %v835_v17, %s1221_s17 }
 0x169   : > { %v710_v20 = vpop.f32.mrf.mxu2 }
 0x16a   : > { %v836_v21 = vmul.f32 %v795_v19, %v710_v20  ;;  %v461_v19 = vmul.f32 0.01, %v408_v13  ;;  %v411_v20 = vadd.f32 %v1499_v30, %v410_v59 }
 0x16c   : > { %877 = vrot.lane.b32.xlu1 %v836_v21, %s1221_s17  ;;  %v477_v21 = vsel %vm445_vm9, %v408_v13, %v461_v19  ;;  %v462_v25 = vmul.f32 0.01, %v411_v20  ;;  %vm446_vm10 = vcmp.gt.f32.partialorder %v411_v20, 0.0 }
 0x171   : > { %v713_v24 = vpop.f32.mrf.mxu2 }
 0x172   : > { %v837_v26 = vmul.f32 %v800_v23, %v713_v24 }
 0x174   : > { %879 = vrot.lane.b32.xlu2 %v837_v26, %s1221_s17  ;;  %v422_v26 = vpop.f32.mrf.mxu0 }
 0x179   : > { %v716_v28 = vpop.f32.mrf.mxu2 }
 0x17a   : > { %v838_v31 = vmul.f32 %v805_v27, %v716_v28  ;;  %v478_v27 = vsel %vm446_vm10, %v411_v20, %v462_v25  ;;  %v423_v28 = vadd.f32 %v1499_v30, %v422_v26 }
 0x17c   : > { %881 = vrot.lane.b32.xlu0 %v838_v31, %s1221_s17  ;;  %v466_v33 = vmul.f32 0.01, %v423_v28  ;;  %vm450_vm11 = vcmp.gt.f32.partialorder %v423_v28, 0.0  ;;  %v425_v49 = vpop.f32.mrf.mxu0 }
 0x17e   : > { %v482_v36 = vsel %vm450_vm11, %v423_v28, %v466_v33 }
 0x181   : > { %v719_v38 = vpop.f32.mrf.mxu3 }
 0x182   : > { %v839_v39 = vmul.f32 %v810_v37, %v719_v38 }
 0x184   : > { %883 = vrot.lane.b32.xlu1 %v839_v39, %s1221_s17 }
 0x186   : > { %v862_v42 = vpop.permute.xlu2 %861 }
 0x187   : > { %v908_v43 = vsel %vm617_vm2, %v473_v40, %v862_v42  ;;  %v420_v40 = vadd.f32 %v1499_v30, %v419_v18 }
 0x188   : > { %924 = vst [vmem:[%s1508_s23 + $0x8] sm:$0xff] %v908_v43 }
 0x189   : > { %v722_v45 = vpop.f32.mrf.mxu3  ;;  %vm449_vm13 = vcmp.gt.f32.partialorder %v420_v40, 0.0 }
 0x18a   : > { %v840_v46 = vmul.f32 %v815_v44, %v722_v45  ;;  %v465_v44 = vmul.f32 0.01, %v420_v40 }
 0x18c   : > { %885 = vrot.lane.b32.xlu2 %v840_v46, %s1221_s17  ;;  %v481_v45 = vsel %vm449_vm13, %v420_v40, %v465_v44  ;;  %v432_v46 = vadd.f32 %v1499_v30, %v1458_v14  ;;  %v428_v14 = vpop.f32.mrf.mxu0 }
 0x18d   : > { %v429_v57 = vadd.f32 %v1499_v30, %v428_v14 }
 0x18e   : > { %vm453_vm14 = vcmp.gt.f32.partialorder %v432_v46, 0.0 }
 0x18f   : > { %vm452_vm0 = vcmp.gt.f32.partialorder %v429_v57, 0.0 }
 0x191   : > { %v725_v50 = vpop.f32.mrf.mxu3 }
 0x192   : > { %v841_v51 = vmul.f32 %v820_v35, %v725_v50  ;;  %v417_v35 = vadd.f32 %v1499_v30, %v416_v9  ;;  %v469_v50 = vmul.f32 0.01, %v432_v46 }
 0x194   : > { %887 = vrot.lane.b32.xlu0 %v841_v51, %s1221_s17  ;;  %v464_v39 = vmul.f32 0.01, %v417_v35  ;;  %vm448_vm12 = vcmp.gt.f32.partialorder %v417_v35, 0.0  ;;  %v426_v51 = vadd.f32 %v1499_v30, %v425_v49 }
 0x196   : > { %v860_v54 = vpop.permute.xlu1 %859  ;;  %v480_v41 = vsel %vm448_vm12, %v417_v35, %v464_v39  ;;  %vm451_vm15 = vcmp.gt.f32.partialorder %v426_v51, 0.0 }
 0x197   : > { %v907_v55 = vsel %vm617_vm2, %v472_v52, %v860_v54  ;;  %v485_v52 = vsel %vm453_vm14, %v432_v46, %v469_v50 }
 0x198   : > { %923 = vst [vmem:[%s1508_s23] sm:$0xff] %v907_v55  ;;  %v467_v55 = vmul.f32 0.01, %v426_v51 }
 0x199   : > { %v728_v58 = vpop.f32.mrf.mxu3 }
 0x19a   : > { %v842_v34 = vmul.f32 %v825_v56, %v728_v58  ;;  %v483_v56 = vsel %vm451_vm15, %v426_v51, %v467_v55 }
 0x19c   : > { %889 = vrot.lane.b32.xlu1 %v842_v34, %s1221_s17  ;;  %v468_v34 = vmul.f32 0.01, %v429_v57 }
 0x19e   : > { %v868_v62 = vpop.permute.xlu2 %867  ;;  %v484_v60 = vsel %vm452_vm0, %v429_v57, %v468_v34 }
 0x19f   : > { %v911_v63 = vsel %vm617_vm2, %v476_v61, %v868_v62 }
 0x1a0   : > { %927 = vst [vmem:[%s1508_s23 + $0x20] sm:$0xff] %v911_v63  ;;  %v435_v63 = vadd.f32 %v1499_v30, %v1465_v22 }
 0x1a2   : > { %v470_v0 = vmul.f32 0.01, %v435_v63  ;;  %vm454_vm1 = vcmp.gt.f32.partialorder %v435_v63, 0.0 }
 0x1a4   : > { %v486_v2 = vsel %vm454_vm1, %v435_v63, %v470_v0 }
 0x1a6   : > { %v864_v4 = vpop.permute.xlu0 %863 }
 0x1a7   : > { %v909_v5 = vsel %vm617_vm2, %v474_v3, %v864_v4 }
 0x1a8   : > { %925 = vst [vmem:[%s1508_s23 + $0x10] sm:$0xff] %v909_v5  ;;  %v471_v5 = vmul.f32 0.01, %v438_v1 }
 0x1aa   : > { %v487_v22 = vsel %vm455_vm3, %v438_v1, %v471_v5 }
 0x1ae   : > { %v866_v10 = vpop.permute.xlu1 %865 }
 0x1af   : > { %v910_v11 = vsel %vm617_vm2, %v475_v7, %v866_v10 }
 0x1b0   : > { %926 = vst [vmem:[%s1508_s23 + $0x18] sm:$0xff] %v910_v11 }
 0x1b6   : > { %v874_v16 = vpop.permute.xlu2 %873 }
 0x1b7   : > { %v914_v17 = vsel %vm617_vm2, %v479_v15, %v874_v16 }
 0x1b8   : > { %930 = vst [vmem:[%s1508_s23 + $0x38] sm:$0xff] %v914_v17 }
 0x1be   : > { %v870_v23 = vpop.permute.xlu0 %869 }
 0x1bf   : > { %v912_v24 = vsel %vm617_vm2, %v477_v21, %v870_v23 }
 0x1c0   : > { %928 = vst [vmem:[%s1508_s23 + $0x28] sm:$0xff] %v912_v24 }
 0x1c6   : > { %v872_v31 = vpop.permute.xlu1 %871 }
 0x1c7   : > { %v913_v32 = vsel %vm617_vm2, %v478_v27, %v872_v31 }
 0x1c8   : > { %929 = vst [vmem:[%s1508_s23 + $0x30] sm:$0xff] %v913_v32 }
 0x1ce   : > { %v880_v37 = vpop.permute.xlu2 %879 }
 0x1cf   : > { %v917_v38 = vsel %vm617_vm2, %v482_v36, %v880_v37 }
 0x1d0   : > { %933 = vst [vmem:[%s1508_s23 + $0x50] sm:$0xff] %v917_v38 }
 0x1d6   : > { %v876_v42 = vpop.permute.xlu0 %875 }
 0x1d7   : > { %v915_v43 = vsel %vm617_vm2, %v480_v41, %v876_v42 }
 0x1d8   : > { %931 = vst [vmem:[%s1508_s23 + $0x40] sm:$0xff] %v915_v43 }
 0x1de   : > { %v878_v47 = vpop.permute.xlu1 %877 }
 0x1df   : > { %v916_v48 = vsel %vm617_vm2, %v481_v45, %v878_v47 }
 0x1e0   : > { %932 = vst [vmem:[%s1508_s23 + $0x48] sm:$0xff] %v916_v48 }
 0x1e6   : > { %v886_v53 = vpop.permute.xlu2 %885 }
 0x1e7   : > { %v920_v54 = vsel %vm617_vm2, %v485_v52, %v886_v53 }
 0x1e8   : > { %936 = vst [vmem:[%s1508_s23 + $0x68] sm:$0xff] %v920_v54 }
 0x1ee   : > { %v882_v58 = vpop.permute.xlu0 %881 }
 0x1ef   : > { %v918_v59 = vsel %vm617_vm2, %v483_v56, %v882_v58 }
 0x1f0   : > { %934 = vst [vmem:[%s1508_s23 + $0x58] sm:$0xff] %v918_v59 }
 0x1f6   : > { %v884_v61 = vpop.permute.xlu1 %883 }
 0x1f7   : > { %v919_v62 = vsel %vm617_vm2, %v484_v60, %v884_v61 }
 0x1f8   : > { %935 = vst [vmem:[%s1508_s23 + $0x60] sm:$0xff] %v919_v62 }
 0x206   : > { %v888_v3 = vpop.permute.xlu0 %887 }
 0x207   : > { %v921_v4 = vsel %vm617_vm2, %v486_v2, %v888_v3 }
 0x208   : > { %937 = vst [vmem:[%s1508_s23 + $0x70] sm:$0xff] %v921_v4 }
 0x20e   : > { %v890_v6 = vpop.permute.xlu1 %889 }
 0x20f   : > { %v922_v29 = vsel %vm617_vm2, %v487_v22, %v890_v6 }
 0x210   : > { %938 = vst [vmem:[%s1508_s23 + $0x78] sm:$0xff] %v922_v29 }
 0x211   : > { %1183 = shalt.err (!%p1180_p3)
}
 0x212   : > { %s1222_s20 = smov 128   ;;  %s1223_s23 = smov 8  }
 0x213   : > { %1108 = dma.vmem_to_hbm [thread:$0]  (%p1302_p5), %s953_s14, 2048, %s955_s15, %s940_s28, %s1222_s20, %s1222_s20, %s1223_s23  }
 0x214 PF: > { %p1114_p4 = scmp.ge.s32.totalorder %s1218_s27, 2  ;;  %s969_s9 = sand.u32 1, %s1206_s24  }
 0x215   : > { %s970_s13 = scalar_lea.sflag [#allocation3], %s969_s9 }
 0x216   : > { %p1111_p7 = pnand %p1114_p4, %p1306_p6 }
 0x218   : > { %p1112_p8 = pneg %p1111_p7 }
 0x21a   : > { %1201 = dma.done.wait (%p1112_p8), %s970_s13, 2048  }
 0x21b   : > { %1203 = vsyncadd (%p1112_p8), %s970_s13, 4294965248  ;;  %p17_p9 = scmp.ge.s32.totalorder %s1289_s30, 4   ;;  %s1606_s24 = smov %s1210_s25 }
 0x21c   : > { %s1607_s25 = smov %s1214_s26  ;;  %s1608_s26 = smov %s1300_s10 }
 0x21d   : > { %s1609_s27 = smov %s1289_s30  ;;  %19 = sbr.rel (!%p17_p9) target bundleno = 3 (0x3), region = 86 }
 0x222   :  { %976 = vsyncpa [#allocation3], 1 }
 0x223   :  { %978 = vsyncpa [#allocation3 + $0x1], 1 }

</bundles_post_ra>
